<compile_context>
chip_gen: v5e
topology: v5e:2x2
jax: 0.10.0
libtpu: 0.0.40
codegen_flags: <defaults>
</compile_context>

<pallas_src>
from dataclasses import dataclass

import jax
import jax.numpy as jnp
import numpy as np
from jax import lax
from jax.experimental import pallas as pl
from jax.experimental.pallas import tpu as pltpu

_LANES = 128  # entries are packed feature-minor into 128-lane rows


@dataclass
class InfNeRFConfig:
    """Configuration (only the fields HashEncoder uses, defaults match original)."""
    base_resolution: int = 32
    num_levels: int = 16
    level_dim: int = 2
    per_level_scale: float = 2.0
    log2_hashmap_size: int = 19


# ---------------------------------------------------------------------------
# Parameter construction (mirrors HashEncoder.__init__)
# ---------------------------------------------------------------------------
def init_hash_encoder(config: InfNeRFConfig, key):
    tables, resolutions, nembs = [], [], []
    for i in range(config.num_levels):
        resolution = int(config.base_resolution * config.per_level_scale ** i)
        params_in_level = min(resolution ** 3, 2 ** config.log2_hashmap_size)
        key, sub = jax.random.split(key)
        w = jax.random.uniform(sub, (params_in_level, config.level_dim),
                               minval=-1e-4, maxval=1e-4, dtype=jnp.float32)
        tables.append(w)
        resolutions.append(resolution)
        nembs.append(params_in_level)
    return tables, resolutions, nembs


def pack_tables(tables, level_dim):
    """Pack per-level (nemb, D) tables into (L, R_max, 128) lane-rows.

    Row r of a level holds entries [r*epr, (r+1)*epr) with epr = 128 // level_dim,
    entry-major / feature-minor, so entry e's features sit at lanes
    [(e % epr) * D, (e % epr) * D + D) of row e // epr (never crossing a lane row).
    """
    assert _LANES % level_dim == 0, "level_dim must divide 128"
    epr = _LANES // level_dim
    num_levels = len(tables)
    r_max = max(-(-t.shape[0] // epr) for t in tables)
    r_max = -(-r_max // 8) * 8  # sublane-align
    packed = np.zeros((num_levels, r_max, _LANES), np.float32)
    for l, t in enumerate(tables):
        flat = np.asarray(t, np.float32).reshape(-1)
        packed[l].reshape(-1)[: flat.size] = flat
    return jnp.asarray(packed)


# ---------------------------------------------------------------------------
# Kernel 1: positions -> per-level flat table indices (vectorized, lane-major)
# ---------------------------------------------------------------------------
def _index_kernel(res_ref, nemb_ref, pos_ref, idx_ref):
    # res_ref, nemb_ref : SMEM int32 (L,)   (scalar-prefetched)
    # pos_ref           : VMEM f32  (3, TILE_N)
    # idx_ref           : VMEM i32  (L, TILE_N)
    pos = pos_ref[...]
    num_levels = idx_ref.shape[0]
    for l in range(num_levels):  # static & tiny -> unrolled; pos reused for all levels
        res_f = res_ref[l].astype(jnp.float32)
        max_idx_f = (nemb_ref[l] - 1).astype(jnp.float32)
        scaled = (pos + 1.0) / 2.0 * (res_f - 1.0)
        scaled = jnp.clip(scaled, 0.0, res_f - 1.0)
        # float32 index math + truncation, exactly as in the PyTorch module
        idx_f = scaled[0] * (res_f * res_f) + scaled[1] * res_f + scaled[2]
        # clamp in f32 first (nemb-1 < 2^24, exact); equivalent to .long() then clamp
        idx_f = jnp.clip(idx_f, 0.0, max_idx_f)
        idx_ref[l, :] = idx_f.astype(jnp.int32)


# ---------------------------------------------------------------------------
# Kernel 2: the actual embedding gather (one level, one tile of points per step)
# ---------------------------------------------------------------------------
def _make_gather_kernel(level_dim, tile_n, chunk=128):
    epr = _LANES // level_dim  # entries per 128-lane row

    def kernel(idx_hbm_ref, tab_ref, out_ref, rows_ref, tgt_ref, idx_smem_ref, sem):
        # idx_hbm_ref : HBM  i32 (L, N_pad)          (raw ref, no auto-DMA)
        # tab_ref     : VMEM f32 (R_max, 128)        (this level's table, resident over n)
        # out_ref     : VMEM f32 (TILE_N, D)
        # rows_ref    : VMEM f32 (TILE_N, 128)       gathered lane-rows
        # tgt_ref     : VMEM i32 (TILE_N, 128)       per-point target lane (splatted)
        # idx_smem_ref: SMEM i32 (2, TILE_N)         double-buffered index tiles
        # sem         : DMA semaphores (2,)
        l = pl.program_id(0)
        n = pl.program_id(1)
        n_tiles = pl.num_programs(1)
        parity = n % 2

        # ---- pipelined index delivery (HBM -> SMEM, hidden behind compute) ---------
        def src_for(tile_idx):
            return idx_hbm_ref.at[pl.ds(l, 1), pl.ds(tile_idx * tile_n, tile_n)]

        def start(tile_idx, slot):  # slot is traced; branch keeps SMEM/sem static
            @pl.when(slot == 0)
            def _():
                pltpu.make_async_copy(src_for(tile_idx),
                                      idx_smem_ref.at[0:1, :], sem.at[0]).start()

            @pl.when(slot == 1)
            def _():
                pltpu.make_async_copy(src_for(tile_idx),
                                      idx_smem_ref.at[1:2, :], sem.at[1]).start()

        def wait_current(slot):
            @pl.when(slot == 0)
            def _():
                pltpu.make_async_copy(src_for(n),
                                      idx_smem_ref.at[0:1, :], sem.at[0]).wait()

            @pl.when(slot == 1)
            def _():
                pltpu.make_async_copy(src_for(n),
                                      idx_smem_ref.at[1:2, :], sem.at[1]).wait()

        # prime the pipeline at the first tile of each level (n restarts at 0 per level,
        # so this is also megacore-safe when the level axis is split across cores)
        @pl.when(n == 0)
        def _():
            start(n, parity)

        # prefetch the next tile's indices before touching this tile's data
        @pl.when(n + 1 < n_tiles)
        def _():
            start(n + 1, (n + 1) % 2)

        wait_current(parity)

        # ---- per-point strip gather: one (1,128) row copy per point (O(N)) ---------
        def fetch(j, carry):
            e = idx_smem_ref[parity, j]
            r = e // epr
            lo = (e % epr) * level_dim
            rows_ref[pl.ds(j, 1), :] = tab_ref[pl.ds(r, 1), :]
            tgt_ref[pl.ds(j, 1), :] = jnp.full((1, _LANES), lo, dtype=jnp.int32)
            return carry

        lax.fori_loop(0, tile_n, fetch, 0, unroll=16)

        # ---- vectorized in-row extraction: lane-only one-hot reduce ----------------
        lane_iota = lax.broadcasted_iota(jnp.int32, (1, _LANES), 1)  # single vreg

        def select(c, carry):
            s = pl.multiple_of(c * chunk, chunk)
            rows = rows_ref[pl.ds(s, chunk), :]   # (chunk, 128) f32
            tgt = tgt_ref[pl.ds(s, chunk), :]     # (chunk, 128) i32
            for d in range(level_dim):            # static & tiny
                sel = (lane_iota == tgt + d).astype(jnp.float32)
                out_ref[pl.ds(s, chunk), pl.ds(d, 1)] = jnp.sum(
                    rows * sel, axis=1, keepdims=True)
            return carry

        lax.fori_loop(0, tile_n // chunk, select, 0)

    return kernel


# ---------------------------------------------------------------------------
# Wrapper
# ---------------------------------------------------------------------------
def hash_encode_pallas(positions, tables_packed, resolutions, nembs, level_dim,
                       tile_n=1024):
    """positions: (N, 3) float32 in [-1, 1]. Returns (N, num_levels * level_dim) f32."""
    assert tile_n % 128 == 0
    assert _LANES % level_dim == 0
    N = positions.shape[0]
    num_levels, r_max, _ = tables_packed.shape
    n_tiles = int(pl.cdiv(N, tile_n))
    n_pad = n_tiles * tile_n

    pos_t = jnp.zeros((3, n_pad), jnp.float32).at[:, :N].set(
        positions.astype(jnp.float32).T)
    res_arr = jnp.asarray(resolutions, jnp.int32)
    nemb_arr = jnp.asarray(nembs, jnp.int32)

    # ---- kernel 1: per-level flat indices --------------------------------------
    idx_all = pl.pallas_call(
        _index_kernel,
        out_shape=jax.ShapeDtypeStruct((num_levels, n_pad), jnp.int32),
        grid_spec=pltpu.PrefetchScalarGridSpec(
            num_scalar_prefetch=2,
            grid=(n_tiles,),
            in_specs=[pl.BlockSpec((3, tile_n), lambda n, r, e: (0, n))],
            out_specs=pl.BlockSpec((num_levels, tile_n), lambda n, r, e: (0, n)),
        ),
        compiler_params=pltpu.CompilerParams(dimension_semantics=("parallel",)),
    )(res_arr, nemb_arr, pos_t)

    # ---- kernel 2: gather -------------------------------------------------------
    table_block_bytes = r_max * _LANES * 4
    vmem_limit = int(2 * table_block_bytes            # double-buffered level table
                     + 2 * tile_n * level_dim * 4     # double-buffered output block
                     + 2 * tile_n * _LANES * 4        # rows + tgt scratch
                     + (12 << 20))                    # temporaries / compiler slack

    out = pl.pallas_call(
        _make_gather_kernel(level_dim, tile_n),
        out_shape=jax.ShapeDtypeStruct((num_levels, n_pad, level_dim), jnp.float32),
        grid=(num_levels, n_tiles),
        in_specs=[
            pl.BlockSpec(memory_space=pl.ANY),        # indices: HBM -> SMEM in kernel
            pl.BlockSpec((None, r_max, _LANES),
                         lambda l, n: (l, 0, 0)),     # level table, resident across n
        ],
        out_specs=pl.BlockSpec((None, tile_n, level_dim), lambda l, n: (l, n, 0)),
        scratch_shapes=[
            pltpu.VMEM((tile_n, _LANES), jnp.float32),
            pltpu.VMEM((tile_n, _LANES), jnp.int32),
            pltpu.SMEM((2, tile_n), jnp.int32),
            pltpu.SemaphoreType.DMA((2,)),
        ],
        compiler_params=pltpu.CompilerParams(
            # level axis parallel (v7x megacore splits by level -> each core keeps its
            # own table block resident); point-tile axis sequential per core.
            dimension_semantics=("parallel", "arbitrary"),
            vmem_limit_bytes=vmem_limit),
    )(idx_all, tables_packed)

    # (L, N_pad, D) -> (N, L*D)  (matches torch.cat over levels on the last dim)
    # TODO(synk): downstream MLP could consume (L, N, D) directly to skip this pass.
    out = out[:, :N, :]
    return jnp.transpose(out, (1, 0, 2)).reshape(N, num_levels * level_dim)


# ---------------------------------------------------------------------------
# Pure-JAX reference (mirrors the PyTorch forward exactly)
# ---------------------------------------------------------------------------
def hash_encode_ref(positions, tables, resolutions, nembs):
    feats = []
    for i, table in enumerate(tables):
        res_f = jnp.float32(resolutions[i])
        scaled = (positions + 1.0) / 2.0 * (res_f - 1.0)
        scaled = jnp.clip(scaled, 0.0, res_f - 1.0)
        idx_f = scaled[..., 0] * (res_f * res_f) + scaled[..., 1] * res_f + scaled[..., 2]
        idx_f = jnp.clip(idx_f, 0.0, jnp.float32(nembs[i] - 1))
        idx = idx_f.astype(jnp.int32)
        feats.append(table[idx])
    return jnp.concatenate(feats, axis=-1)


if __name__ == "__main__":
    # Small config consistent with the module (4 levels, level_dim=2 -> output dim 8)
    config = InfNeRFConfig(base_resolution=8, num_levels=4, level_dim=2,
                           per_level_scale=2.0, log2_hashmap_size=12)

    key = jax.random.PRNGKey(0)
    k_pos, k_params = jax.random.split(key)

    N = 1000  # not a tile multiple -> exercises padding; 4 tiles -> exercises prefetch
    positions = jax.random.uniform(k_pos, (N, 3), minval=-1.0, maxval=1.0,
                                   dtype=jnp.float32)

    tables, resolutions, nembs = init_hash_encoder(config, k_params)
    tables_packed = pack_tables(tables, config.level_dim)  # (L, R_max, 128)

    out = hash_encode_pallas(positions, tables_packed, resolutions, nembs,
                             config.level_dim, tile_n=256)
    out = jax.block_until_ready(out)

    ref = hash_encode_ref(positions, tables, resolutions, nembs)

    assert out.shape == (N, config.num_levels * config.level_dim), out.shape
    np.testing.assert_allclose(np.asarray(out), np.asarray(ref), rtol=0, atol=1e-6)

    print("KERNEL_OK")
</pallas_src>

<mosaic_0001>
module attributes {stable_mosaic.version = 11 : i64} {
  func.func @_index_kernel(%arg0: i32, %arg1: memref<4xi32, #tpu.memory_space<smem>>, %arg2: memref<4xi32, #tpu.memory_space<smem>>, %arg3: memref<3x256xf32, #tpu.memory_space<vmem>>, %arg4: memref<4x256xi32, #tpu.memory_space<vmem>>) attributes {dimension_semantics = [#tpu.dimension_semantics<parallel>], iteration_bounds = array<i64: 4>, scalar_prefetch = 2 : i64, scratch_operands = 0 : i64, tpu.core_type = #tpu.core_type<tc>, window_params = [{transform_indices = @transform_0, window_bounds = array<i64: 3, 256>}, {transform_indices = @transform_1, window_bounds = array<i64: 4, 256>}]} {
    %c0 = arith.constant 0 : index
    %c0_0 = arith.constant 0 : index
    %0 = vector.load %arg3[%c0, %c0_0] : memref<3x256xf32, #tpu.memory_space<vmem>>, vector<3x256xf32>
    %c0_1 = arith.constant 0 : index
    %1 = memref.load %arg1[%c0_1] : memref<4xi32, #tpu.memory_space<smem>>
    %2 = arith.sitofp %1 : i32 to f32
    %c0_2 = arith.constant 0 : index
    %3 = memref.load %arg2[%c0_2] : memref<4xi32, #tpu.memory_space<smem>>
    %c1_i32 = arith.constant 1 : i32
    %4 = arith.subi %3, %c1_i32 : i32
    %5 = arith.sitofp %4 : i32 to f32
    %cst = arith.constant 1.000000e+00 : f32
    %6 = vector.broadcast %cst : f32 to vector<3x256xf32>
    %7 = arith.addf %0, %6 : vector<3x256xf32>
    %cst_3 = arith.constant 2.000000e+00 : f32
    %8 = vector.broadcast %cst_3 : f32 to vector<3x256xf32>
    %9 = arith.divf %7, %8 : vector<3x256xf32>
    %cst_4 = arith.constant 1.000000e+00 : f32
    %10 = arith.subf %2, %cst_4 : f32
    %11 = vector.broadcast %10 : f32 to vector<3x256xf32>
    %12 = arith.mulf %9, %11 : vector<3x256xf32>
    %cst_5 = arith.constant 1.000000e+00 : f32
    %13 = arith.subf %2, %cst_5 : f32
    %cst_6 = arith.constant 0.000000e+00 : f32
    %14 = vector.broadcast %cst_6 : f32 to vector<3x256xf32>
    %15 = arith.maximumf %14, %12 : vector<3x256xf32>
    %16 = vector.broadcast %13 : f32 to vector<3x256xf32>
    %17 = arith.minimumf %16, %15 : vector<3x256xf32>
    %18 = vector.extract_strided_slice %17 {offsets = [0, 0], sizes = [1, 256], strides = [1, 1]} : vector<3x256xf32> to vector<1x256xf32>
    %19 = vector.shape_cast %18 : vector<1x256xf32> to vector<256xf32>
    %20 = arith.mulf %2, %2 : f32
    %21 = vector.broadcast %20 : f32 to vector<256xf32>
    %22 = arith.mulf %19, %21 : vector<256xf32>
    %23 = vector.extract_strided_slice %17 {offsets = [1, 0], sizes = [1, 256], strides = [1, 1]} : vector<3x256xf32> to vector<1x256xf32>
    %24 = vector.shape_cast %23 : vector<1x256xf32> to vector<256xf32>
    %25 = vector.broadcast %2 : f32 to vector<256xf32>
    %26 = arith.mulf %24, %25 : vector<256xf32>
    %27 = arith.addf %22, %26 : vector<256xf32>
    %28 = vector.extract_strided_slice %17 {offsets = [2, 0], sizes = [1, 256], strides = [1, 1]} : vector<3x256xf32> to vector<1x256xf32>
    %29 = vector.shape_cast %28 : vector<1x256xf32> to vector<256xf32>
    %30 = arith.addf %27, %29 : vector<256xf32>
    %cst_7 = arith.constant 0.000000e+00 : f32
    %31 = vector.broadcast %cst_7 : f32 to vector<256xf32>
    %32 = arith.maximumf %31, %30 : vector<256xf32>
    %33 = vector.broadcast %5 : f32 to vector<256xf32>
    %34 = arith.minimumf %33, %32 : vector<256xf32>
    %35 = arith.fptosi %34 : vector<256xf32> to vector<256xi32>
    %c0_8 = arith.constant 0 : index
    %c0_9 = arith.constant 0 : index
    %36 = vector.load %arg4[%c0_8, %c0_9] : memref<4x256xi32, #tpu.memory_space<vmem>>, vector<1x256xi32>
    %37 = vector.shape_cast %36 : vector<1x256xi32> to vector<256xi32>
    %38 = vector.shape_cast %35 : vector<256xi32> to vector<1x256xi32>
    tpu.vector_store %arg4[%c0_8, %c0_9], %38 {strides = array<i32>} : memref<4x256xi32, #tpu.memory_space<vmem>>, vector<1x256xi32>,
    %c1 = arith.constant 1 : index
    %39 = memref.load %arg1[%c1] : memref<4xi32, #tpu.memory_space<smem>>
    %40 = arith.sitofp %39 : i32 to f32
    %c1_10 = arith.constant 1 : index
    %41 = memref.load %arg2[%c1_10] : memref<4xi32, #tpu.memory_space<smem>>
    %c1_i32_11 = arith.constant 1 : i32
    %42 = arith.subi %41, %c1_i32_11 : i32
    %43 = arith.sitofp %42 : i32 to f32
    %cst_12 = arith.constant 1.000000e+00 : f32
    %44 = vector.broadcast %cst_12 : f32 to vector<3x256xf32>
    %45 = arith.addf %0, %44 : vector<3x256xf32>
    %cst_13 = arith.constant 2.000000e+00 : f32
    %46 = vector.broadcast %cst_13 : f32 to vector<3x256xf32>
    %47 = arith.divf %45, %46 : vector<3x256xf32>
    %cst_14 = arith.constant 1.000000e+00 : f32
    %48 = arith.subf %40, %cst_14 : f32
    %49 = vector.broadcast %48 : f32 to vector<3x256xf32>
    %50 = arith.mulf %47, %49 : vector<3x256xf32>
    %cst_15 = arith.constant 1.000000e+00 : f32
    %51 = arith.subf %40, %cst_15 : f32
    %cst_16 = arith.constant 0.000000e+00 : f32
    %52 = vector.broadcast %cst_16 : f32 to vector<3x256xf32>
    %53 = arith.maximumf %52, %50 : vector<3x256xf32>
    %54 = vector.broadcast %51 : f32 to vector<3x256xf32>
    %55 = arith.minimumf %54, %53 : vector<3x256xf32>
    %56 = vector.extract_strided_slice %55 {offsets = [0, 0], sizes = [1, 256], strides = [1, 1]} : vector<3x256xf32> to vector<1x256xf32>
    %57 = vector.shape_cast %56 : vector<1x256xf32> to vector<256xf32>
    %58 = arith.mulf %40, %40 : f32
    %59 = vector.broadcast %58 : f32 to vector<256xf32>
    %60 = arith.mulf %57, %59 : vector<256xf32>
    %61 = vector.extract_strided_slice %55 {offsets = [1, 0], sizes = [1, 256], strides = [1, 1]} : vector<3x256xf32> to vector<1x256xf32>
    %62 = vector.shape_cast %61 : vector<1x256xf32> to vector<256xf32>
    %63 = vector.broadcast %40 : f32 to vector<256xf32>
    %64 = arith.mulf %62, %63 : vector<256xf32>
    %65 = arith.addf %60, %64 : vector<256xf32>
    %66 = vector.extract_strided_slice %55 {offsets = [2, 0], sizes = [1, 256], strides = [1, 1]} : vector<3x256xf32> to vector<1x256xf32>
    %67 = vector.shape_cast %66 : vector<1x256xf32> to vector<256xf32>
    %68 = arith.addf %65, %67 : vector<256xf32>
    %cst_17 = arith.constant 0.000000e+00 : f32
    %69 = vector.broadcast %cst_17 : f32 to vector<256xf32>
    %70 = arith.maximumf %69, %68 : vector<256xf32>
    %71 = vector.broadcast %43 : f32 to vector<256xf32>
    %72 = arith.minimumf %71, %70 : vector<256xf32>
    %73 = arith.fptosi %72 : vector<256xf32> to vector<256xi32>
    %c1_18 = arith.constant 1 : index
    %c0_19 = arith.constant 0 : index
    %74 = vector.load %arg4[%c1_18, %c0_19] : memref<4x256xi32, #tpu.memory_space<vmem>>, vector<1x256xi32>
    %75 = vector.shape_cast %74 : vector<1x256xi32> to vector<256xi32>
    %76 = vector.shape_cast %73 : vector<256xi32> to vector<1x256xi32>
    tpu.vector_store %arg4[%c1_18, %c0_19], %76 {strides = array<i32>} : memref<4x256xi32, #tpu.memory_space<vmem>>, vector<1x256xi32>,
    %c2 = arith.constant 2 : index
    %77 = memref.load %arg1[%c2] : memref<4xi32, #tpu.memory_space<smem>>
    %78 = arith.sitofp %77 : i32 to f32
    %c2_20 = arith.constant 2 : index
    %79 = memref.load %arg2[%c2_20] : memref<4xi32, #tpu.memory_space<smem>>
    %c1_i32_21 = arith.constant 1 : i32
    %80 = arith.subi %79, %c1_i32_21 : i32
    %81 = arith.sitofp %80 : i32 to f32
    %cst_22 = arith.constant 1.000000e+00 : f32
    %82 = vector.broadcast %cst_22 : f32 to vector<3x256xf32>
    %83 = arith.addf %0, %82 : vector<3x256xf32>
    %cst_23 = arith.constant 2.000000e+00 : f32
    %84 = vector.broadcast %cst_23 : f32 to vector<3x256xf32>
    %85 = arith.divf %83, %84 : vector<3x256xf32>
    %cst_24 = arith.constant 1.000000e+00 : f32
    %86 = arith.subf %78, %cst_24 : f32
    %87 = vector.broadcast %86 : f32 to vector<3x256xf32>
    %88 = arith.mulf %85, %87 : vector<3x256xf32>
    %cst_25 = arith.constant 1.000000e+00 : f32
    %89 = arith.subf %78, %cst_25 : f32
    %cst_26 = arith.constant 0.000000e+00 : f32
    %90 = vector.broadcast %cst_26 : f32 to vector<3x256xf32>
    %91 = arith.maximumf %90, %88 : vector<3x256xf32>
    %92 = vector.broadcast %89 : f32 to vector<3x256xf32>
    %93 = arith.minimumf %92, %91 : vector<3x256xf32>
    %94 = vector.extract_strided_slice %93 {offsets = [0, 0], sizes = [1, 256], strides = [1, 1]} : vector<3x256xf32> to vector<1x256xf32>
    %95 = vector.shape_cast %94 : vector<1x256xf32> to vector<256xf32>
    %96 = arith.mulf %78, %78 : f32
    %97 = vector.broadcast %96 : f32 to vector<256xf32>
    %98 = arith.mulf %95, %97 : vector<256xf32>
    %99 = vector.extract_strided_slice %93 {offsets = [1, 0], sizes = [1, 256], strides = [1, 1]} : vector<3x256xf32> to vector<1x256xf32>
    %100 = vector.shape_cast %99 : vector<1x256xf32> to vector<256xf32>
    %101 = vector.broadcast %78 : f32 to vector<256xf32>
    %102 = arith.mulf %100, %101 : vector<256xf32>
    %103 = arith.addf %98, %102 : vector<256xf32>
    %104 = vector.extract_strided_slice %93 {offsets = [2, 0], sizes = [1, 256], strides = [1, 1]} : vector<3x256xf32> to vector<1x256xf32>
    %105 = vector.shape_cast %104 : vector<1x256xf32> to vector<256xf32>
    %106 = arith.addf %103, %105 : vector<256xf32>
    %cst_27 = arith.constant 0.000000e+00 : f32
    %107 = vector.broadcast %cst_27 : f32 to vector<256xf32>
    %108 = arith.maximumf %107, %106 : vector<256xf32>
    %109 = vector.broadcast %81 : f32 to vector<256xf32>
    %110 = arith.minimumf %109, %108 : vector<256xf32>
    %111 = arith.fptosi %110 : vector<256xf32> to vector<256xi32>
    %c2_28 = arith.constant 2 : index
    %c0_29 = arith.constant 0 : index
    %112 = vector.load %arg4[%c2_28, %c0_29] : memref<4x256xi32, #tpu.memory_space<vmem>>, vector<1x256xi32>
    %113 = vector.shape_cast %112 : vector<1x256xi32> to vector<256xi32>
    %114 = vector.shape_cast %111 : vector<256xi32> to vector<1x256xi32>
    tpu.vector_store %arg4[%c2_28, %c0_29], %114 {strides = array<i32>} : memref<4x256xi32, #tpu.memory_space<vmem>>, vector<1x256xi32>,
    %c3 = arith.constant 3 : index
    %115 = memref.load %arg1[%c3] : memref<4xi32, #tpu.memory_space<smem>>
    %116 = arith.sitofp %115 : i32 to f32
    %c3_30 = arith.constant 3 : index
    %117 = memref.load %arg2[%c3_30] : memref<4xi32, #tpu.memory_space<smem>>
    %c1_i32_31 = arith.constant 1 : i32
    %118 = arith.subi %117, %c1_i32_31 : i32
    %119 = arith.sitofp %118 : i32 to f32
    %cst_32 = arith.constant 1.000000e+00 : f32
    %120 = vector.broadcast %cst_32 : f32 to vector<3x256xf32>
    %121 = arith.addf %0, %120 : vector<3x256xf32>
    %cst_33 = arith.constant 2.000000e+00 : f32
    %122 = vector.broadcast %cst_33 : f32 to vector<3x256xf32>
    %123 = arith.divf %121, %122 : vector<3x256xf32>
    %cst_34 = arith.constant 1.000000e+00 : f32
    %124 = arith.subf %116, %cst_34 : f32
    %125 = vector.broadcast %124 : f32 to vector<3x256xf32>
    %126 = arith.mulf %123, %125 : vector<3x256xf32>
    %cst_35 = arith.constant 1.000000e+00 : f32
    %127 = arith.subf %116, %cst_35 : f32
    %cst_36 = arith.constant 0.000000e+00 : f32
    %128 = vector.broadcast %cst_36 : f32 to vector<3x256xf32>
    %129 = arith.maximumf %128, %126 : vector<3x256xf32>
    %130 = vector.broadcast %127 : f32 to vector<3x256xf32>
    %131 = arith.minimumf %130, %129 : vector<3x256xf32>
    %132 = vector.extract_strided_slice %131 {offsets = [0, 0], sizes = [1, 256], strides = [1, 1]} : vector<3x256xf32> to vector<1x256xf32>
    %133 = vector.shape_cast %132 : vector<1x256xf32> to vector<256xf32>
    %134 = arith.mulf %116, %116 : f32
    %135 = vector.broadcast %134 : f32 to vector<256xf32>
    %136 = arith.mulf %133, %135 : vector<256xf32>
    %137 = vector.extract_strided_slice %131 {offsets = [1, 0], sizes = [1, 256], strides = [1, 1]} : vector<3x256xf32> to vector<1x256xf32>
    %138 = vector.shape_cast %137 : vector<1x256xf32> to vector<256xf32>
    %139 = vector.broadcast %116 : f32 to vector<256xf32>
    %140 = arith.mulf %138, %139 : vector<256xf32>
    %141 = arith.addf %136, %140 : vector<256xf32>
    %142 = vector.extract_strided_slice %131 {offsets = [2, 0], sizes = [1, 256], strides = [1, 1]} : vector<3x256xf32> to vector<1x256xf32>
    %143 = vector.shape_cast %142 : vector<1x256xf32> to vector<256xf32>
    %144 = arith.addf %141, %143 : vector<256xf32>
    %cst_37 = arith.constant 0.000000e+00 : f32
    %145 = vector.broadcast %cst_37 : f32 to vector<256xf32>
    %146 = arith.maximumf %145, %144 : vector<256xf32>
    %147 = vector.broadcast %119 : f32 to vector<256xf32>
    %148 = arith.minimumf %147, %146 : vector<256xf32>
    %149 = arith.fptosi %148 : vector<256xf32> to vector<256xi32>
    %c3_38 = arith.constant 3 : index
    %c0_39 = arith.constant 0 : index
    %150 = vector.load %arg4[%c3_38, %c0_39] : memref<4x256xi32, #tpu.memory_space<vmem>>, vector<1x256xi32>
    %151 = vector.shape_cast %150 : vector<1x256xi32> to vector<256xi32>
    %152 = vector.shape_cast %149 : vector<256xi32> to vector<1x256xi32>
    tpu.vector_store %arg4[%c3_38, %c0_39], %152 {strides = array<i32>} : memref<4x256xi32, #tpu.memory_space<vmem>>, vector<1x256xi32>,
    return
  }
  func.func @transform_0(%arg0: i32, %arg1: memref<4xi32, #tpu.memory_space<smem>>, %arg2: memref<4xi32, #tpu.memory_space<smem>>) -> (i32, i32) {
    %c0_i32 = arith.constant 0 : i32
    %c0_i32_0 = arith.constant 0 : i32
    return %c0_i32, %arg0 : i32, i32
  }
  func.func @transform_1(%arg0: i32, %arg1: memref<4xi32, #tpu.memory_space<smem>>, %arg2: memref<4xi32, #tpu.memory_space<smem>>) -> (i32, i32) {
    %c0_i32 = arith.constant 0 : i32
    %c0_i32_0 = arith.constant 0 : i32
    return %c0_i32, %arg0 : i32, i32
  }
}

</mosaic_0001>

<bundles_post_ra>
// kernel: tpu_custom_call.1
= control target key start
LH: loop header
LB: loop body
LE: loop exit
PB: predicated region body
PF: predicated region fallthrough
CT: control target
= control target key end

     0   :  { %s621_s18 = smov [#allocation3]   ;;  %s622_s19 = smov [#allocation4]   ;;  %s831_s0 = inlined_call_operand.hbm [shape: s32[4], index: 0, kind: input, shape index: {}]   ;;  %s832_s2 = inlined_call_operand.hbm [shape: f32[3,1024], index: 2, kind: input, shape index: {}]   ;;  %s833_s3 = inlined_call_operand.hbm [shape: s32[4,1024], index: 3, kind: output, shape index: {}]   ;;  %s834_s1 = inlined_call_operand.hbm [shape: s32[4], index: 1, kind: input, shape index: {}]  }
   0x1   :  { %s9_s14 = sshll.u32 %s831_s0, 4  ;;  %s14_s17 = sshll.u32 %s834_s1, 4  ;;  %s10_s14 = int_to_ptr.hbm [resolvable:$true] %s9_s14  ;;  %s15_s17 = int_to_ptr.hbm [resolvable:$true] %s14_s17 }
   0x2   :  { %12 = dma.hbm_to_smem %s10_s14, 16, %s621_s18, [#allocation2] }
   0x3   :  { %17 = dma.hbm_to_smem %s15_s17, 16, %s622_s19, [#allocation2] }
   0x4   :  { %595 = dma.done.wait [#allocation2], 32 }
   0x5   :  { %596 = vsyncadd [#allocation2], 4294967264 }
   0x6   :  { %20 = sfence }
   0x7   :  { %21 = vsyncpa [#allocation6], 0 }
   0x8   :  { %23 = vsyncpa [#allocation6 + $0x1], 0 }
   0x9   :  { %24 = vsyncpa [#allocation7], 0 }
   0xa   :  { %26 = vsyncpa [#allocation7 + $0x1], 0  ;;  %s650_s20 = smov 0   ;;  %s652_s0 = smov 0  }
   0xb   :  { %s654_s21 = smov 0   ;;  %s656_s1 = smov 0  }
   0xc LB: > { %s671_s22 = sadd.s32 4294967295, %s619_s1   ;;  %s385_s23 = sadd.s32 4294967294, %s619_s1   ;;  %s619_s1 = sphi %s656_s1, %s845_s1   ;;  %s615_s21 = sphi %s654_s21, %s844_s21   ;;  %s611_s0 = sphi %s652_s0, %s843_s0   ;;  %s607_s20 = sphi %s650_s20, %s842_s20  }
   0xd   : > { %s675_s24 = sadd.s32 1, %s619_s1   ;;  %s39_s25 = sadd.s32 1, %s615_s21 }
   0xe   : > { %s36_s26 = ssub.s32 %s619_s1, %s675_s24  ;;  %p46_p0 = scmp.ne.s32.totalorder %s615_s21, %s611_s0 }
   0xf   : > { %p37_p1 = scmp.eq.s32.totalorder %s36_s26, 0  ;;  %p47_p2 = scmp.eq.s32.totalorder %s619_s1, 0 }
  0x10   : > { %p52_p3 = scmp.ne.s32.totalorder %s611_s0, %s607_s20  ;;  %p53_p4 = scmp.eq.s32.totalorder %s671_s22, 0 }
  0x11   : > { %s687_s27 = scalar_select %p37_p1, %s615_s21, %s39_s25  }
  0x12   : > { %p689_p5 = por %p47_p2, %p46_p0  ;;  %p693_p6 = por %p53_p4, %p52_p3 }
  0x13   : > { %p76_p7 = scmp.eq.s32.totalorder %s671_s22, 3  ;;  %p82_p8 = scmp.eq.s32.totalorder %s385_s23, 3 }
  0x14   : > { %p458_p9 = scmp.lt.s32.totalorder %s619_s1, 4  ;;  %s102_s5 = sand.u32 1, %s615_s21  }
  0x15   : > { %p699_p10 = por %p76_p7, %p46_p0  ;;  %p703_p11 = por %p82_p8, %p52_p3 }
  0x16   : > { %s424_s6 = sshll.u32 %s619_s1, 3  ;;  %s388_s7 = sshll.u32 %s102_s5, 3 }
  0x17   : > { %s111_s10 = scalar_lea.hbm %s832_s2, %s424_s6  ;;  %s106_s12 = scalar_lea.vmem [#allocation5], %s388_s7 }
  0x18   : > { %s113_s11 = sshll.u32 %s111_s10, 4  ;;  %s115_s13 = sshll.u32 %s106_s12, 4  ;;  %s114_s11 = int_to_ptr.hbm [resolvable:$true] %s113_s11  ;;  %s116_s13 = int_to_ptr.vmem [resolvable:$true] %s115_s13 }
  0x19   : > { %p714_p12 = pnand %p458_p9, %p689_p5  ;;  %p391_p13 = scmp.ge.s32.totalorder %s619_s1, 1 }
  0x1a   : > { %p120_p0 = scmp.lt.s32.totalorder %s619_s1, 5  ;;  %s103_s15 = scalar_lea.sflag [#allocation6], %s102_s5 }
  0x1b   : > { %s521_s16 = sshra.s32 %s114_s11, 4  ;;  %p525_p2 = pneg %p714_p12  ;;  %s522_s16 = int_to_ptr.hbm [resolvable:$true] %s521_s16 }
  0x1c   : > { %s523_s17 = scalar_lea.hbm %s522_s16, 8  ;;  %s528_s23 = scalar_lea.hbm %s832_s2, 32 }
  0x1d   : > { %p524_p1 = scmp.ne.s32.totalorder %s522_s16, %s523_s17  ;;  %p529_p5 = scmp.lt.s32.totalorder %s522_s16, %s832_s2 }
  0x1e   : > { %p530_p7 = scmp.lt.s32.totalorder %s528_s23, %s523_s17 }
  0x1f   : > { %p526_p3 = pnand %p525_p2, %p524_p1 }
  0x20   : > { %p531_p8 = por %p530_p7, %p529_p5 }
  0x21   : > { %p527_p4 = pneg %p526_p3 }
  0x23   : > { %p532_p9 = pnand %p531_p8, %p527_p4 }
  0x25   : > { %535 = shalt.err (!%p532_p9)
}
  0x26   : > { %453 = dma.hbm_to_vmem [thread:$0]  (!%p714_p12), %s114_s11, 128, %s116_s13, %s103_s15  }
  0x27   : > { %p121_p1 = pnand %p391_p13, %p120_p0 }
  0x28   : > { %s735_s28 = sand.u32 (!%p121_p1), 1, %s611_s0  }
  0x29   : > { %124 = sbr.rel (%p121_p1) target bundleno = 98 (0x62), region = 24  ;;  %s392_s5 = sshll.u32 (!%p121_p1), %s735_s28, 3 }
  0x2a   : > { %s127_s6 = scalar_lea.sflag (!%p121_p1), [#allocation6], %s735_s28  ;;  %s130_s7 = scalar_lea.vmem (!%p121_p1), [#allocation5], %s392_s5 }
  0x2e   : > { %598 = dma.done.wait (%p693_p6), %s127_s6, 128  }
  0x2f   : > { %600 = vsyncadd (%p693_p6), %s127_s6, 4294967168  ;;  %s153_s8 = sld [smem:[#allocation3]]  ;;  %v623_v0 = vmov 2.0   ;;  %v152_v3 = vld [vmem:[%s130_s7] sm:$0x77]  ;;  %vm192_vm5 = vcmask 1040384  }
  0x30   : > { %495 = vrcp.f32 %v623_v0  ;;  %s398_s9 = sld [smem:[#allocation3 + $0x1]]  ;;  %v158_v6 = vadd.f32 1.0, %v152_v3  ;;  %v194_v3 = vlaneseq }
  0x31   : > { %s405_s10 = sld [smem:[#allocation3 + $0x2]] }
  0x32   : > { %s412_s12 = sld [smem:[#allocation3 + $0x3]]  ;;  %vm785_vm6 = vcmp.lt.s32.totalorder %v194_v3, 256 }
  0x33   : > { %s754_s17 = sld [smem:[#allocation4]] }
  0x34   : > { %s758_s19 = sld [smem:[#allocation4 + $0x1]] }
  0x35   : > { %s745_s11 = scvt.s32.f32 %s153_s8  ;;  %s765_s6 = sld [smem:[#allocation4 + $0x2]] }
  0x36   : > { %v496_v1 = vpop.eup %495  ;;  %s747_s13 = scvt.s32.f32 %s398_s9  ;;  %s769_s8 = sld [smem:[#allocation4 + $0x3]] }
  0x37   : > { %v160_v2 = vmul.f32 2.0, %v496_v1  ;;  %s395_s14 = sadd.f32 -1.0, %s745_s11  ;;  %s750_s29 = scvt.s32.f32 %s405_s10  ;;  %vm164_vm0 = vweird.f32 %v496_v1  ;;  %v175_v17 = vstv %s745_s11 }
  0x38   : > { %s401_s15 = sadd.f32 -1.0, %s747_s13  ;;  %s756_s18 = scvt.s32.f32 %s412_s12  ;;  %v212_v24 = vstv %s747_s13 }
  0x39   : > { %v161_v4 = vsub.f32 1.0, %v160_v2  ;;  %s408_s16 = sadd.f32 -1.0, %s750_s29  ;;  %v168_v9 = vstv %s395_s14  ;;  %s172_s23 = smul.f32 %s745_s11, %s745_s11  ;;  %v245_v25 = vstv %s750_s29 }
  0x3a   : > { %v205_v10 = vstv %s401_s15  ;;  %s415_s25 = sadd.f32 -1.0, %s756_s18  ;;  %s209_s26 = smul.f32 %s747_s13, %s747_s13  ;;  %v278_v33 = vstv %s756_s18 }
  0x3b   : > { %v162_v5 = vmul.f32 %v496_v1, %v161_v4  ;;  %v238_v11 = vstv %s408_s16  ;;  %s242_s7 = smul.f32 %s750_s29, %s750_s29  ;;  %v173_v20 = vstv %s172_s23  ;;  %s394_s10 = sadd.s32 4294967295, %s754_s17 }
  0x3c   : > { %v271_v16 = vstv %s415_s25  ;;  %s275_s9 = smul.f32 %s756_s18, %s756_s18  ;;  %v210_v23 = vstv %s209_s26  ;;  %s400_s11 = sadd.s32 4294967295, %s758_s19 }
  0x3d   : > { %v163_v7 = vadd.f32 %v496_v1, %v162_v5  ;;  %v243_v30 = vstv %s242_s7  ;;  %s407_s12 = sadd.s32 4294967295, %s765_s6  ;;  %s414_s13 = sadd.s32 4294967295, %s769_s8 }
  0x3e   : > { %v276_v32 = vstv %s275_s9  ;;  %s157_s14 = scvt.s32.f32 %s394_s10  ;;  %s203_s29 = scvt.s32.f32 %s400_s11 }
  0x3f   : > { %v165_v8 = vsel %vm164_vm0, %v496_v1, %v163_v7  ;;  %s236_s15 = scvt.s32.f32 %s407_s12  ;;  %s269_s16 = scvt.s32.f32 %s414_s13 }
  0x40   : > { %v166_v12 = vmul.f32 %v165_v8, %v158_v6  ;;  %v188_v55 = vstv %s157_s14  ;;  %v225_v59 = vstv %s203_s29  ;;  %s425_s17 = sshll.u32 %s671_s22, 3  ;;  %s149_s22 = scalar_lea.vmem [#allocation8], %s392_s5 }
  0x41   : > { %v258_v60 = vstv %s236_s15  ;;  %v291_v0 = vstv %s269_s16  ;;  %s310_s23 = scalar_lea.hbm %s833_s3, %s425_s17  ;;  %s312_s25 = sshll.u32 %s149_s22, 4  ;;  %s313_s25 = int_to_ptr.vmem [resolvable:$true] %s312_s25 }
  0x42   : > { %v169_v13 = vmul.f32 %v168_v9, %v166_v12  ;;  %v206_v14 = vmul.f32 %v205_v10, %v166_v12  ;;  %v239_v15 = vmul.f32 %v238_v11, %v166_v12  ;;  %v272_v18 = vmul.f32 %v271_v16, %v166_v12  ;;  %s314_s26 = sshll.u32 %s310_s23, 4  ;;  %s299_s5 = scalar_lea.sflag [#allocation7], %s735_s28  ;;  %s315_s26 = int_to_ptr.hbm [resolvable:$true] %s314_s26 }
  0x43   : > { %s565_s6 = sshra.s32 %s315_s26, 4  ;;  %s571_s10 = scalar_lea.hbm %s833_s3, 32  ;;  %s566_s6 = int_to_ptr.hbm [resolvable:$true] %s565_s6 }
  0x44   : > { %v170_v19 = vmax.f32 %v169_v13, 0.0  ;;  %v207_v21 = vmax.f32 %v206_v14, 0.0  ;;  %v240_v22 = vmax.f32 %v239_v15, 0.0  ;;  %v273_v26 = vmax.f32 %v272_v18, 0.0  ;;  %s567_s7 = scalar_lea.hbm %s566_s6, 8  ;;  %p572_p0 = scmp.lt.s32.totalorder %s566_s6, %s833_s3 }
  0x45   : > { %p568_p6 = scmp.ne.s32.totalorder %s566_s6, %s567_s7  ;;  %p573_p2 = scmp.lt.s32.totalorder %s571_s10, %s567_s7 }
  0x46   : > { %v171_v27 = vmin.f32 %v168_v9, %v170_v19  ;;  %v208_v28 = vmin.f32 %v205_v10, %v207_v21  ;;  %v241_v29 = vmin.f32 %v238_v11, %v240_v22  ;;  %v274_v31 = vmin.f32 %v271_v16, %v273_v26 }
  0x47   : > { %p569_p12 = pnand %p568_p6, %p699_p10  ;;  %p574_p3 = por %p573_p2, %p572_p0 }
  0x48   : > { %v174_v34 = vmul.f32 %v173_v20, %v171_v27  ;;  %v176_v35 = vmul.f32 %v175_v17, %v171_v27  ;;  %v211_v36 = vmul.f32 %v210_v23, %v208_v28  ;;  %v213_v37 = vmul.f32 %v212_v24, %v208_v28 }
  0x49   : > { %v244_v38 = vmul.f32 %v243_v30, %v241_v29  ;;  %v246_v39 = vmul.f32 %v245_v25, %v241_v29  ;;  %v397_v41 = vrot.slane %v171_v27, 10  ;;  %v277_v42 = vmul.f32 %v276_v32, %v274_v31  ;;  %p570_p13 = pneg %p569_p12 }
  0x4a   : > { %v396_v40 = vrot.slane %v176_v35, 9  ;;  %v279_v43 = vmul.f32 %v278_v33, %v274_v31  ;;  %v402_v44 = vrot.slane %v213_v37, 9  ;;  %v403_v45 = vrot.slane %v208_v28, 10 }
  0x4b   : > { %v409_v46 = vrot.slane %v246_v39, 9  ;;  %v410_v47 = vrot.slane %v241_v29, 10  ;;  %v417_v50 = vrot.slane %v274_v31, 10  ;;  %p575_p4 = pnand %p574_p3, %p570_p13 }
  0x4c   : > { %v181_v48 = vadd.f32 %v396_v40, %v174_v34  ;;  %v416_v49 = vrot.slane %v279_v43, 9  ;;  %v218_v51 = vadd.f32 %v402_v44, %v211_v36 }
  0x4d   : > { %v251_v52 = vadd.f32 %v409_v46, %v244_v38 }
  0x4e   : > { %v186_v53 = vadd.f32 %v397_v41, %v181_v48  ;;  %v284_v54 = vadd.f32 %v416_v49, %v277_v42  ;;  %v223_v56 = vadd.f32 %v403_v45, %v218_v51 }
  0x4f   : > { %v256_v57 = vadd.f32 %v410_v47, %v251_v52 }
  0x50   : > { %v187_v58 = vmax.f32 %v186_v53, 0.0  ;;  %v289_v61 = vadd.f32 %v417_v50, %v284_v54  ;;  %v224_v62 = vmax.f32 %v223_v56, 0.0 }
  0x51   : > { %v257_v63 = vmax.f32 %v256_v57, 0.0 }
  0x52   : > { %v189_v1 = vmin.f32 %v188_v55, %v187_v58  ;;  %v290_v2 = vmax.f32 %v289_v61, 0.0  ;;  %v226_v4 = vmin.f32 %v225_v59, %v224_v62 }
  0x53   : > { %v259_v5 = vmin.f32 %v258_v60, %v257_v63 }
  0x54   : > { %vm426_vm1 = vcmp.lt.s32.totalorder %v189_v1, 0  ;;  %v427_v6 = vceil.f32 %v189_v1  ;;  %v428_v7 = vfloor.f32 %v189_v1  ;;  %v292_v8 = vmin.f32 %v291_v0, %v290_v2 }
  0x55   : > { %vm431_vm2 = vcmp.lt.s32.totalorder %v226_v4, 0  ;;  %v432_v9 = vceil.f32 %v226_v4  ;;  %v433_v10 = vfloor.f32 %v226_v4  ;;  %vm436_vm3 = vcmp.lt.s32.totalorder %v259_v5, 0 }
  0x56   : > { %v429_v11 = vsel %vm426_vm1, %v427_v6, %v428_v7  ;;  %v437_v12 = vceil.f32 %v259_v5  ;;  %v438_v13 = vfloor.f32 %v259_v5  ;;  %vm441_vm4 = vcmp.lt.s32.totalorder %v292_v8, 0 }
  0x57   : > { %v430_v14 = vcvt.f32.s32 %v429_v11  ;;  %v434_v15 = vsel %vm431_vm2, %v432_v9, %v433_v10  ;;  %v442_v16 = vceil.f32 %v292_v8  ;;  %v443_v17 = vfloor.f32 %v292_v8 }
  0x58   : > { %v435_v18 = vcvt.f32.s32 %v434_v15  ;;  %v439_v19 = vsel %vm436_vm3, %v437_v12, %v438_v13 }
  0x59   : > { %v191_v20 = vrot.slane %v430_v14, 3  ;;  %v440_v22 = vcvt.f32.s32 %v439_v19  ;;  %v444_v23 = vsel %vm441_vm4, %v442_v16, %v443_v17 }
  0x5a   : > { %v228_v24 = vrot.slane %v435_v18, 3  ;;  %v445_v25 = vcvt.f32.s32 %v444_v23 }
  0x5b   : > { %v193_v26 = vsel %vm192_vm5, %v430_v14, %v191_v20  ;;  %v261_v27 = vrot.slane %v440_v22, 3 }
  0x5c   : > { %198 = vst.msk [vmem:[%s149_s22] ss:$4 sm:$0x3] %vm785_vm6, %v193_v26  ;;  %v229_v28 = vsel %vm192_vm5, %v435_v18, %v228_v24  ;;  %v294_v29 = vrot.slane %v445_v25, 3 }
  0x5d   : > { %404 = vst.msk [vmem:[%s149_s22 + $0x1] ss:$4 sm:$0x3] %vm785_vm6, %v229_v28  ;;  %v262_v30 = vsel %vm192_vm5, %v440_v22, %v261_v27 }
  0x5e   : > { %411 = vst.msk [vmem:[%s149_s22 + $0x2] ss:$4 sm:$0x3] %vm785_vm6, %v262_v30  ;;  %v295_v31 = vsel %vm192_vm5, %v445_v25, %v294_v29 }
  0x5f   : > { %418 = vst.msk [vmem:[%s149_s22 + $0x3] ss:$4 sm:$0x3] %vm785_vm6, %v295_v31 }
  0x60   : > { %578 = shalt.err (!%p575_p4)
}
  0x61   : > { %448 = dma.vmem_to_hbm [thread:$0]  (%p699_p10), %s313_s25, 128, %s315_s26, %s299_s5  }
  0x62 PF: > { %p459_p5 = scmp.ge.s32.totalorder %s619_s1, 2  ;;  %s326_s28 = sand.u32 1, %s607_s20  }
  0x63   : > { %s327_s13 = scalar_lea.sflag [#allocation7], %s326_s28 }
  0x64   : > { %p455_p7 = pnand %p459_p5, %p703_p11 }
  0x66   : > { %p456_p8 = pneg %p455_p7 }
  0x68   : > { %602 = dma.done.wait (%p456_p8), %s327_s13, 128  }
  0x69   : > { %604 = vsyncadd (%p456_p8), %s327_s13, 4294967168  ;;  %p29_p9 = scmp.ge.s32.totalorder %s675_s24, 6   ;;  %s842_s20 = smov %s611_s0 }
  0x6a   : > { %s843_s0 = smov %s615_s21  ;;  %s844_s21 = smov %s687_s27 }
  0x6b   : > { %s845_s1 = smov %s675_s24  ;;  %31 = sbr.rel (!%p29_p9) target bundleno = 12 (0xc), region = 72 }
  0x70   :  { %333 = vsyncpa [#allocation6], 1 }
  0x71   :  { %335 = vsyncpa [#allocation6 + $0x1], 1 }
  0x72   :  { %336 = vsyncpa [#allocation7], 1 }
  0x73   :  { %338 = vsyncpa [#allocation7 + $0x1], 1 }

</bundles_post_ra>
